<compile_context>
chip_gen: v6e
topology: v6e:2x2x1
jax: 0.10.0
libtpu: 0.0.40
codegen_flags: <defaults>
</compile_context>

<pallas_src>
import jax
import jax.numpy as jnp
from jax.experimental import pallas as pl
from jax.experimental.pallas import tpu as pltpu


def _round_up(x, m):
    return ((x + m - 1) // m) * m


# -----------------------------------------------------------------------------
# Pallas kernel: whole MLP forward for one tile of batch rows
# -----------------------------------------------------------------------------
def _mlp_fused_kernel(x_ref, w1_ref, s1_ref, w2_ref, s2_ref, w3_ref, s3_ref, o_ref):
    # ---- Layer 1: Linear (BN1 scale folded into W1) + f32 shift + ReLU --------
    h = jnp.dot(x_ref[...], w1_ref[...], preferred_element_type=jnp.float32)
    h = jnp.maximum(h + s1_ref[...], 0.0)
    # ---- Layer 2 ---------------------------------------------------------------
    h = jnp.dot(h.astype(jnp.bfloat16), w2_ref[...], preferred_element_type=jnp.float32)
    h = jnp.maximum(h + s2_ref[...], 0.0)
    # ---- Layer 3 (no ReLU) + softmax over classes -------------------------------
    z = jnp.dot(h.astype(jnp.bfloat16), w3_ref[...], preferred_element_type=jnp.float32)
    z = z + s3_ref[...]  # padded classes carry shift = -1e30 -> probability 0
    m = jnp.max(z, axis=-1, keepdims=True)
    e = jnp.exp(z - m)
    denom = jnp.sum(e, axis=-1, keepdims=True)
    # Approximate reciprocal runs on the EUP slot (idle after exp), freeing the VPU.
    o_ref[...] = e * pl.reciprocal(denom, approx=True)


# -----------------------------------------------------------------------------
# One-time parameter preparation (hoisted out of the per-call forward path)
# -----------------------------------------------------------------------------
def prepare_mlp_params(params, eps=1e-5):
    """Fold eval-mode BN into the Linears, pad to TPU tiles, cast weights to bf16.

    Runs ONCE per parameter set; mlp_forward then only pads/casts x and issues a
    single pallas_call.
    """
    def fold(w, b, bn):
        scale = bn["gamma"] / jnp.sqrt(bn["var"] + eps)
        return w * scale[None, :], (b - bn["mean"]) * scale + bn["beta"]

    w1, s1 = fold(params["w1"], params["b1"], params["bn1"])
    w2, s2 = fold(params["w2"], params["b2"], params["bn2"])
    w3, s3 = fold(params["w3"], params["b3"], params["bn3"])

    K, inner = w1.shape
    num_out = w3.shape[1]

    # Pad contraction / lane dims to multiples of 128. Zero padding is exact:
    # padded hidden units have zero in-weights and zero shift -> ReLU(0) = 0.
    Kp = _round_up(max(K, 128), 128)
    Ip = _round_up(max(inner, 128), 128)
    Np = _round_up(max(num_out, 128), 128)

    prepared = {
        "w1": jnp.pad(w1, ((0, Kp - K), (0, Ip - inner))).astype(jnp.bfloat16),
        "s1": jnp.pad(s1, ((0, Ip - inner),)).reshape(1, Ip).astype(jnp.float32),
        "w2": jnp.pad(w2, ((0, Ip - inner), (0, Ip - inner))).astype(jnp.bfloat16),
        "s2": jnp.pad(s2, ((0, Ip - inner),)).reshape(1, Ip).astype(jnp.float32),
        "w3": jnp.pad(w3, ((0, Ip - inner), (0, Np - num_out))).astype(jnp.bfloat16),
        # Padded classes get a very negative shift so softmax gives them probability 0.
        "s3": jnp.pad(s3, ((0, Np - num_out),), constant_values=-1e30)
                 .reshape(1, Np).astype(jnp.float32),
    }
    return prepared, num_out


# -----------------------------------------------------------------------------
# Forward: pad/cast x, one fused pallas_call, slice away padding
# -----------------------------------------------------------------------------
def mlp_forward(x, prepared, num_out):
    B = x.shape[0]
    x2d = x.reshape(B, -1)  # x.view(B, -1)
    K = x2d.shape[1]
    Kp, Ip = prepared["w1"].shape
    Np = prepared["w3"].shape[1]

    # Batch-row padding / tiling: multiples of 16 rows (full bf16 sublane packing).
    Mp = _round_up(max(B, 16), 16)
    TM_CAP = 1024  # stays under v5e's 16 MiB default scoped VMEM; fine on v6e/v7x
    if Mp > TM_CAP:
        tm = TM_CAP
    elif Mp >= 512:
        # Keep the parallel grid >= 2 steps so v7x's two TensorCores both get work.
        tm = _round_up((Mp + 1) // 2, 16)
    else:
        tm = Mp
    Mp = _round_up(Mp, tm)
    grid = (Mp // tm,)

    x_p = jnp.pad(x2d, ((0, Mp - B), (0, Kp - K))).astype(jnp.bfloat16)

    out = pl.pallas_call(
        _mlp_fused_kernel,
        out_shape=jax.ShapeDtypeStruct((Mp, Np), jnp.float32),
        grid=grid,
        in_specs=[
            pl.BlockSpec((tm, Kp), lambda i: (i, 0)),   # x tile (rows), bf16
            pl.BlockSpec((Kp, Ip), lambda i: (0, 0)),   # W1 (BN1 folded), bf16
            pl.BlockSpec((1, Ip), lambda i: (0, 0)),    # shift1, f32
            pl.BlockSpec((Ip, Ip), lambda i: (0, 0)),   # W2 (BN2 folded), bf16
            pl.BlockSpec((1, Ip), lambda i: (0, 0)),    # shift2, f32
            pl.BlockSpec((Ip, Np), lambda i: (0, 0)),   # W3 (BN3 folded), bf16
            pl.BlockSpec((1, Np), lambda i: (0, 0)),    # shift3, f32 (-1e30 on pads)
        ],
        out_specs=pl.BlockSpec((tm, Np), lambda i: (i, 0)),
        compiler_params=pltpu.CompilerParams(
            dimension_semantics=("parallel",),
            # Explicit budget: at tm=1024 the double-buffered x/out tiles + weights +
            # f32 temps total ~8 MiB, well under 32 MiB on v5e/v6e/v7x.
            vmem_limit_bytes=32 * 1024 * 1024,
        ),
    )(x_p, prepared["w1"], prepared["s1"], prepared["w2"], prepared["s2"],
      prepared["w3"], prepared["s3"])
    return out[:B, :num_out]


# -----------------------------------------------------------------------------
# Deterministic parameter construction + pure-JAX reference
# -----------------------------------------------------------------------------
class _KeyGen:
    def __init__(self, key):
        self.key = key

    def __call__(self):
        self.key, sub = jax.random.split(self.key)
        return sub


def _make_bn(kg, n):
    return {
        "gamma": 1.0 + 0.1 * jax.random.normal(kg(), (n,), jnp.float32),
        "beta": 0.1 * jax.random.normal(kg(), (n,), jnp.float32),
        "mean": 0.1 * jax.random.normal(kg(), (n,), jnp.float32),
        "var": jax.random.uniform(kg(), (n,), jnp.float32, minval=0.5, maxval=1.5),
    }


def make_mlp_params(key, num_inputs, num_outputs, inner_dim=128):
    kg = _KeyGen(key)

    def lin(cin, cout):
        bound = 1.0 / float(cin) ** 0.5
        w = jax.random.uniform(kg(), (cin, cout), jnp.float32, -bound, bound)
        b = jax.random.uniform(kg(), (cout,), jnp.float32, -bound, bound)
        return w, b

    w1, b1 = lin(num_inputs, inner_dim)
    w2, b2 = lin(inner_dim, inner_dim)
    w3, b3 = lin(inner_dim, num_outputs)
    return {
        "w1": w1, "b1": b1, "bn1": _make_bn(kg, inner_dim),
        "w2": w2, "b2": b2, "bn2": _make_bn(kg, inner_dim),
        "w3": w3, "b3": b3, "bn3": _make_bn(kg, num_outputs),
    }


def mlp_reference(x, params, eps=1e-5):
    """Pure-JAX f32 reference of the PyTorch module in eval mode."""
    h = x.reshape(x.shape[0], -1).astype(jnp.float32)
    for i in (1, 2, 3):
        w, b, bn = params[f"w{i}"], params[f"b{i}"], params[f"bn{i}"]
        h = h @ w + b
        h = (h - bn["mean"]) / jnp.sqrt(bn["var"] + eps) * bn["gamma"] + bn["beta"]
        if i < 3:
            h = jnp.maximum(h, 0.0)
    return jax.nn.softmax(h, axis=1)


# -----------------------------------------------------------------------------
# Main
# -----------------------------------------------------------------------------
if __name__ == "__main__":
    key = jax.random.PRNGKey(0)
    k_param, k_input = jax.random.split(key)

    # Shapes implied by the module: x.view(B, -1) -> Linear(num_inputs, 128) -> ... -> 10.
    x = jax.random.normal(k_input, (2, 4, 16, 16), jnp.float32)  # B=2, flat dim = 1024
    num_inputs = 4 * 16 * 16
    num_outputs = 10
    params = make_mlp_params(k_param, num_inputs, num_outputs, inner_dim=128)

    # Hoisted once per parameter set: BN folding + padding + bf16 cast.
    prepared, num_out = prepare_mlp_params(params)
    prepared = jax.block_until_ready(prepared)

    fwd = jax.jit(lambda xx, pp: mlp_forward(xx, pp, num_out))
    probs = jax.block_until_ready(fwd(x, prepared))

    assert probs.shape == (2, num_outputs), probs.shape
    assert bool(jnp.all(jnp.isfinite(probs)))
    # approx reciprocal in the softmax denominator -> rows sum to 1 within ~1e-3.
    assert bool(jnp.allclose(jnp.sum(probs, axis=1), 1.0, atol=5e-3))

    ref = mlp_reference(x, params)
    assert bool(jnp.allclose(probs, ref, atol=5e-2)), float(jnp.max(jnp.abs(probs - ref)))

    print("KERNEL_OK")
</pallas_src>

<mosaic_0001>
module attributes {stable_mosaic.version = 11 : i64} {
  func.func @_mlp_fused_kernel(%arg0: i32, %arg1: memref<16x1024xbf16, #tpu.memory_space<vmem>>, %arg2: memref<1024x128xbf16, #tpu.memory_space<vmem>>, %arg3: memref<1x128xf32, #tpu.memory_space<vmem>>, %arg4: memref<128x128xbf16, #tpu.memory_space<vmem>>, %arg5: memref<1x128xf32, #tpu.memory_space<vmem>>, %arg6: memref<128x128xbf16, #tpu.memory_space<vmem>>, %arg7: memref<1x128xf32, #tpu.memory_space<vmem>>, %arg8: memref<16x128xf32, #tpu.memory_space<vmem>>) attributes {dimension_semantics = [#tpu.dimension_semantics<parallel>], iteration_bounds = array<i64: 1>, scalar_prefetch = 0 : i64, scratch_operands = 0 : i64, tpu.core_type = #tpu.core_type<tc>, window_params = [{transform_indices = @transform_0, window_bounds = array<i64: 16, 1024>}, {pipeline_mode = #tpu.pipeline_mode<synchronous>, transform_indices = @transform_1, window_bounds = array<i64: 1024, 128>}, {pipeline_mode = #tpu.pipeline_mode<synchronous>, transform_indices = @transform_2, window_bounds = array<i64: 1, 128>}, {pipeline_mode = #tpu.pipeline_mode<synchronous>, transform_indices = @transform_3, window_bounds = array<i64: 128, 128>}, {pipeline_mode = #tpu.pipeline_mode<synchronous>, transform_indices = @transform_4, window_bounds = array<i64: 1, 128>}, {pipeline_mode = #tpu.pipeline_mode<synchronous>, transform_indices = @transform_5, window_bounds = array<i64: 128, 128>}, {pipeline_mode = #tpu.pipeline_mode<synchronous>, transform_indices = @transform_6, window_bounds = array<i64: 1, 128>}, {transform_indices = @transform_7, window_bounds = array<i64: 16, 128>}]} {
    %c0 = arith.constant 0 : index
    %c0_0 = arith.constant 0 : index
    %0 = vector.load %arg1[%c0, %c0_0] : memref<16x1024xbf16, #tpu.memory_space<vmem>>, vector<16x1024xbf16>
    %c0_1 = arith.constant 0 : index
    %c0_2 = arith.constant 0 : index
    %1 = vector.load %arg2[%c0_1, %c0_2] : memref<1024x128xbf16, #tpu.memory_space<vmem>>, vector<1024x128xbf16>
    %cst = arith.constant dense<0.000000e+00> : vector<16x128xf32>
    %2 = tpu.matmul %0, %1, %cst {dimension_numbers = #tpu.dot_dimension_numbers<[1], [0], [0], [1], [0, 0, 1, 1], [], []>} : vector<16x1024xbf16>, vector<1024x128xbf16>, vector<16x128xf32> -> vector<16x128xf32>
    %c0_3 = arith.constant 0 : index
    %c0_4 = arith.constant 0 : index
    %3 = vector.load %arg3[%c0_3, %c0_4] : memref<1x128xf32, #tpu.memory_space<vmem>>, vector<1x128xf32>
    %4 = vector.broadcast %3 : vector<1x128xf32> to vector<16x128xf32>
    %5 = arith.addf %2, %4 : vector<16x128xf32>
    %cst_5 = arith.constant 0.000000e+00 : f32
    %6 = vector.broadcast %cst_5 : f32 to vector<16x128xf32>
    %7 = arith.maximumf %5, %6 : vector<16x128xf32>
    %8 = arith.truncf %7 : vector<16x128xf32> to vector<16x128xbf16>
    %c0_6 = arith.constant 0 : index
    %c0_7 = arith.constant 0 : index
    %9 = vector.load %arg4[%c0_6, %c0_7] : memref<128x128xbf16, #tpu.memory_space<vmem>>, vector<128x128xbf16>
    %cst_8 = arith.constant dense<0.000000e+00> : vector<16x128xf32>
    %10 = tpu.matmul %8, %9, %cst_8 {dimension_numbers = #tpu.dot_dimension_numbers<[1], [0], [0], [1], [0, 0, 1, 1], [], []>} : vector<16x128xbf16>, vector<128x128xbf16>, vector<16x128xf32> -> vector<16x128xf32>
    %c0_9 = arith.constant 0 : index
    %c0_10 = arith.constant 0 : index
    %11 = vector.load %arg5[%c0_9, %c0_10] : memref<1x128xf32, #tpu.memory_space<vmem>>, vector<1x128xf32>
    %12 = vector.broadcast %11 : vector<1x128xf32> to vector<16x128xf32>
    %13 = arith.addf %10, %12 : vector<16x128xf32>
    %cst_11 = arith.constant 0.000000e+00 : f32
    %14 = vector.broadcast %cst_11 : f32 to vector<16x128xf32>
    %15 = arith.maximumf %13, %14 : vector<16x128xf32>
    %16 = arith.truncf %15 : vector<16x128xf32> to vector<16x128xbf16>
    %c0_12 = arith.constant 0 : index
    %c0_13 = arith.constant 0 : index
    %17 = vector.load %arg6[%c0_12, %c0_13] : memref<128x128xbf16, #tpu.memory_space<vmem>>, vector<128x128xbf16>
    %cst_14 = arith.constant dense<0.000000e+00> : vector<16x128xf32>
    %18 = tpu.matmul %16, %17, %cst_14 {dimension_numbers = #tpu.dot_dimension_numbers<[1], [0], [0], [1], [0, 0, 1, 1], [], []>} : vector<16x128xbf16>, vector<128x128xbf16>, vector<16x128xf32> -> vector<16x128xf32>
    %c0_15 = arith.constant 0 : index
    %c0_16 = arith.constant 0 : index
    %19 = vector.load %arg7[%c0_15, %c0_16] : memref<1x128xf32, #tpu.memory_space<vmem>>, vector<1x128xf32>
    %20 = vector.broadcast %19 : vector<1x128xf32> to vector<16x128xf32>
    %21 = arith.addf %18, %20 : vector<16x128xf32>
    %cst_17 = arith.constant dense<0xFF800000> : vector<16xf32>
    %22 = vector.multi_reduction <maximumf>, %21, %cst_17 [1] : vector<16x128xf32> to vector<16xf32>
    %23 = vector.shape_cast %22 : vector<16xf32> to vector<16x1xf32>
    %24 = vector.broadcast %23 : vector<16x1xf32> to vector<16x128xf32>
    %25 = arith.subf %21, %24 : vector<16x128xf32>
    %26 = math.exp %25 : vector<16x128xf32>
    %cst_18 = arith.constant dense<0.000000e+00> : vector<16xf32>
    %27 = vector.multi_reduction <add>, %26, %cst_18 [1] : vector<16x128xf32> to vector<16xf32>
    %28 = vector.shape_cast %27 : vector<16xf32> to vector<16x1xf32>
    %29 = tpu.reciprocal %28 {approx = true} : vector<16x1xf32> -> vector<16x1xf32>
    %30 = vector.broadcast %29 : vector<16x1xf32> to vector<16x128xf32>
    %31 = arith.mulf %26, %30 : vector<16x128xf32>
    %c0_19 = arith.constant 0 : index
    %c0_20 = arith.constant 0 : index
    %32 = vector.load %arg8[%c0_19, %c0_20] : memref<16x128xf32, #tpu.memory_space<vmem>>, vector<16x128xf32>
    tpu.vector_store %arg8[%c0_19, %c0_20], %31 {strides = array<i32>} : memref<16x128xf32, #tpu.memory_space<vmem>>, vector<16x128xf32>,
    return
  }
  func.func @transform_0(%arg0: i32) -> (i32, i32) {
    %c0_i32 = arith.constant 0 : i32
    %c0_i32_0 = arith.constant 0 : i32
    return %arg0, %c0_i32 : i32, i32
  }
  func.func @transform_1(%arg0: i32) -> (i32, i32) {
    %c0_i32 = arith.constant 0 : i32
    %c0_i32_0 = arith.constant 0 : i32
    %c0_i32_1 = arith.constant 0 : i32
    return %c0_i32, %c0_i32_0 : i32, i32
  }
  func.func @transform_2(%arg0: i32) -> (i32, i32) {
    %c0_i32 = arith.constant 0 : i32
    %c0_i32_0 = arith.constant 0 : i32
    %c0_i32_1 = arith.constant 0 : i32
    return %c0_i32, %c0_i32_0 : i32, i32
  }
  func.func @transform_3(%arg0: i32) -> (i32, i32) {
    %c0_i32 = arith.constant 0 : i32
    %c0_i32_0 = arith.constant 0 : i32
    %c0_i32_1 = arith.constant 0 : i32
    return %c0_i32, %c0_i32_0 : i32, i32
  }
  func.func @transform_4(%arg0: i32) -> (i32, i32) {
    %c0_i32 = arith.constant 0 : i32
    %c0_i32_0 = arith.constant 0 : i32
    %c0_i32_1 = arith.constant 0 : i32
    return %c0_i32, %c0_i32_0 : i32, i32
  }
  func.func @transform_5(%arg0: i32) -> (i32, i32) {
    %c0_i32 = arith.constant 0 : i32
    %c0_i32_0 = arith.constant 0 : i32
    %c0_i32_1 = arith.constant 0 : i32
    return %c0_i32, %c0_i32_0 : i32, i32
  }
  func.func @transform_6(%arg0: i32) -> (i32, i32) {
    %c0_i32 = arith.constant 0 : i32
    %c0_i32_0 = arith.constant 0 : i32
    %c0_i32_1 = arith.constant 0 : i32
    return %c0_i32, %c0_i32_0 : i32, i32
  }
  func.func @transform_7(%arg0: i32) -> (i32, i32) {
    %c0_i32 = arith.constant 0 : i32
    %c0_i32_0 = arith.constant 0 : i32
    return %arg0, %c0_i32 : i32, i32
  }
}

</mosaic_0001>

<bundles_post_ra>
// kernel: _lambda_.1
= control target key start
LH: loop header
LB: loop body
LE: loop exit
PB: predicated region body
PF: predicated region fallthrough
CT: control target
= control target key end

     0   :  { %12 = vsyncpa [#allocation3], 0  ;;  %s1379_s24 = smov [#allocation2]   ;;  %s1532_s0 = inlined_call_operand.vmem [shape: bf16[16,1024], index: 0, kind: input, shape index: {}]   ;;  %s1533_s1 = inlined_call_operand.hbm [shape: bf16[1024,128], index: 1, kind: input, shape index: {}]   ;;  %s1534_s2 = inlined_call_operand.vmem [shape: f32[1,128], index: 2, kind: input, shape index: {}]   ;;  %s1535_s3 = inlined_call_operand.vmem [shape: bf16[128,128], index: 3, kind: input, shape index: {}]   ;;  %s1536_s4 = inlined_call_operand.vmem [shape: f32[1,128], index: 4, kind: input, shape index: {}]   ;;  %s1537_s5 = inlined_call_operand.vmem [shape: bf16[128,128], index: 5, kind: input, shape index: {}]   ;;  %s1538_s6 = inlined_call_operand.vmem [shape: f32[1,128], index: 6, kind: input, shape index: {}]   ;;  %s1539_s7 = inlined_call_operand.vmem [shape: f32[16,128], index: 7, kind: output, shape index: {}]  }
   0x1   :  { %s20_s25 = sshll.u32 %s1379_s24, 4  ;;  %s21_s25 = int_to_ptr.vmem [resolvable:$true] %s20_s25 }
   0x2   :  { %s1365_s26 = scalar_lea.vmem %s21_s25, 8192  ;;  %p1370_p1 = scmp.lt.s32.totalorder %s21_s25, %s21_s25 }
   0x3   :  { %p1366_p0 = scmp.ne.s32.totalorder %s21_s25, %s1365_s26  ;;  %p1371_p2 = scmp.lt.s32.totalorder %s1365_s26, %s1365_s26 }
   0x5   :  { %p1372_p3 = por %p1371_p2, %p1370_p1 }
   0x7   :  { %p1373_p4 = pnand %p1372_p3, %p1366_p0 }
   0x9   :  { %1376 = shalt.err (!%p1373_p4)
}
   0xa   :  { %s1380_s27 = smov 64   ;;  %s1381_s28 = smov 4  }
   0xb   :  { %26 = dma.hbm_to_vmem [thread:$0]  %s1533_s1, 8192, %s21_s25, [#allocation3], %s1380_s27, %s1380_s27, %s1381_s28  }
   0xc   :  { %1377 = dma.done.wait [#allocation3], 8192  }
   0xd   :  { %1378 = vsyncadd [#allocation3], 4294959104  ;;  %v1269_v0 = vld [vmem:[#allocation2 + $0x78] sm:$0xff]   ;;  %v1273_v4 = vld [vmem:[#allocation2 + $0x70] sm:$0xff]   ;;  %vm1383_vm0 = vmmov 0  }
   0xe   :  { %v1270_v1 = vld [vmem:[#allocation2 + $0xf8] sm:$0xff]   ;;  %1118 = vmatprep.subr.bf16.mxu0 %v1269_v0  ;;  %v1274_v5 = vld [vmem:[#allocation2 + $0xf0] sm:$0xff]   ;;  %v1277_v8 = vld [vmem:[#allocation2 + $0x68] sm:$0xff]  }
   0xf   :  { %v1271_v2 = vld [vmem:[#allocation2 + $0x38] sm:$0xff]   ;;  %1140 = vmatprep.subr.bf16.mxu1 %v1270_v1  ;;  %v1275_v6 = vld [vmem:[#allocation2 + $0x30] sm:$0xff]   ;;  %v1278_v9 = vld [vmem:[#allocation2 + $0xe8] sm:$0xff]  }
  0x10   :  { %v1272_v3 = vld [vmem:[#allocation2 + $0xb8] sm:$0xff]   ;;  %1119 = vmatpush3.bf16.msra.mxu0 %v1271_v2  ;;  %v1276_v7 = vld [vmem:[#allocation2 + $0xb0] sm:$0xff]   ;;  %v1279_v10 = vld [vmem:[#allocation2 + $0x28] sm:$0xff]  }
  0x11   :  { %1141 = vmatpush3.bf16.msra.mxu1 %v1272_v3  ;;  %1120 = vmatprep.subr.bf16.mxu0 %v1273_v4  ;;  %v1280_v11 = vld [vmem:[#allocation2 + $0xa8] sm:$0xff]   ;;  %v1281_v12 = vld [vmem:[#allocation2 + $0x60] sm:$0xff]   ;;  %v1285_v16 = vld [vmem:[#allocation2 + $0x58] sm:$0xff]  }
  0x12   :  { %1142 = vmatprep.subr.bf16.mxu1 %v1274_v5  ;;  %v1282_v13 = vld [vmem:[#allocation2 + $0xe0] sm:$0xff]   ;;  %v1286_v17 = vld [vmem:[#allocation2 + $0xd8] sm:$0xff]   ;;  %v1289_v20 = vld [vmem:[#allocation2 + $0x50] sm:$0xff]  }
  0x13   :  { %v1283_v14 = vld [vmem:[#allocation2 + $0x20] sm:$0xff]   ;;  %v1287_v18 = vld [vmem:[#allocation2 + $0x18] sm:$0xff]   ;;  %v1290_v21 = vld [vmem:[#allocation2 + $0xd0] sm:$0xff]  }
  0x14   :  { %1121 = vmatpush3.bf16.msra.mxu0 %v1275_v6  ;;  %v1284_v15 = vld [vmem:[#allocation2 + $0xa0] sm:$0xff]   ;;  %v1288_v19 = vld [vmem:[#allocation2 + $0x98] sm:$0xff]   ;;  %v1291_v22 = vld [vmem:[#allocation2 + $0x10] sm:$0xff]  }
  0x15   :  { %1143 = vmatpush3.bf16.msra.mxu1 %v1276_v7  ;;  %1122 = vmatprep.subr.bf16.mxu0 %v1277_v8  ;;  %v1292_v23 = vld [vmem:[#allocation2 + $0x90] sm:$0xff]   ;;  %v1293_v24 = vld [vmem:[#allocation2 + $0x48] sm:$0xff]   ;;  %v1297_v28 = vld [vmem:[#allocation2 + $0x40] sm:$0xff]  }
  0x16   :  { %1144 = vmatprep.subr.bf16.mxu1 %v1278_v9  ;;  %v1294_v25 = vld [vmem:[#allocation2 + $0xc8] sm:$0xff]   ;;  %v1298_v29 = vld [vmem:[#allocation2 + $0xc0] sm:$0xff]   ;;  %v1301_v40 = vld [vmem:[#allocation2 + $0x178] sm:$0xff]  }
  0x17   :  { %v1295_v26 = vld [vmem:[#allocation2 + $0x8] sm:$0xff]   ;;  %v1299_v30 = vld [vmem:[#allocation2] sm:$0xff]   ;;  %v1302_v41 = vld [vmem:[#allocation2 + $0x1f8] sm:$0xff]  }
  0x18   :  { %1123 = vmatpush3.bf16.msra.mxu0 %v1279_v10  ;;  %v1296_v27 = vld [vmem:[#allocation2 + $0x88] sm:$0xff]   ;;  %v1300_v31 = vld [vmem:[#allocation2 + $0x80] sm:$0xff]   ;;  %v1303_v42 = vld [vmem:[#allocation2 + $0x138] sm:$0xff]  }
  0x19   :  { %1145 = vmatpush3.bf16.msra.mxu1 %v1280_v11  ;;  %1124 = vmatprep.subr.bf16.mxu0 %v1281_v12  ;;  %v41_v32 = vld [vmem:[%s1532_s0] sm:$0xff]  ;;  %v42_v34 = vld [vmem:[%s1532_s0 + $0x8] sm:$0xff]  ;;  %v1304_v43 = vld [vmem:[#allocation2 + $0x1b8] sm:$0xff]  }
  0x1a   :  { %1146 = vmatprep.subr.bf16.mxu1 %v1282_v13  ;;  %v45_v33 = vld [vmem:[%s1532_s0 + $0x20] sm:$0xff]  ;;  %v46_v37 = vld [vmem:[%s1532_s0 + $0x28] sm:$0xff]  ;;  %v1305_v44 = vld [vmem:[#allocation2 + $0x170] sm:$0xff]  }
  0x1b   :  { %v1028_v35 = vcombine.low %v41_v32, %v45_v33  ;;  %v1029_v36 = vcombine.high %v41_v32, %v45_v33  ;;  %v1030_v38 = vcombine.low %v42_v34, %v46_v37  ;;  %v1031_v39 = vcombine.high %v42_v34, %v46_v37  ;;  %v1306_v45 = vld [vmem:[#allocation2 + $0x1f0] sm:$0xff]   ;;  %v1309_v48 = vld [vmem:[#allocation2 + $0x168] sm:$0xff]   ;;  %v1313_v52 = vld [vmem:[#allocation2 + $0x160] sm:$0xff]  }
  0x1c   :  { %1125 = vmatpush3.bf16.msra.mxu0 %v1283_v14  ;;  %v1307_v46 = vld [vmem:[#allocation2 + $0x130] sm:$0xff]   ;;  %v1310_v49 = vld [vmem:[#allocation2 + $0x1e8] sm:$0xff]   ;;  %v1314_v53 = vld [vmem:[#allocation2 + $0x1e0] sm:$0xff]  }
  0x1d   :  { %1147 = vmatpush3.bf16.msra.mxu1 %v1284_v15  ;;  %1126 = vmatprep.subr.bf16.mxu0 %v1285_v16  ;;  %v1308_v47 = vld [vmem:[#allocation2 + $0x1b0] sm:$0xff]   ;;  %v1311_v50 = vld [vmem:[#allocation2 + $0x128] sm:$0xff]   ;;  %v1315_v54 = vld [vmem:[#allocation2 + $0x120] sm:$0xff]  }
  0x1e   :  { %1148 = vmatprep.subr.bf16.mxu1 %v1286_v17  ;;  %640 = vmatprep.mubr.bf16.mxu0 %v1029_v36  ;;  %v1312_v51 = vld [vmem:[#allocation2 + $0x1a8] sm:$0xff]   ;;  %v1316_v55 = vld [vmem:[#allocation2 + $0x1a0] sm:$0xff]   ;;  %v1317_v56 = vld [vmem:[#allocation2 + $0x158] sm:$0xff]   ;;  %v1382_v17 = vmov 0.0  }
  0x1f   :  { %681 = vmatprep.mubr.bf16.mxu1 %v1031_v39  ;;  %v1318_v57 = vld [vmem:[#allocation2 + $0x1d8] sm:$0xff]   ;;  %v1321_v60 = vld [vmem:[#allocation2 + $0x150] sm:$0xff]   ;;  %v1325_v0 = vld [vmem:[#allocation2 + $0x148] sm:$0xff]  }
  0x20   :  { %1127 = vmatpush3.bf16.msra.mxu0 %v1287_v18  ;;  %v1319_v58 = vld [vmem:[#allocation2 + $0x118] sm:$0xff]   ;;  %v1322_v61 = vld [vmem:[#allocation2 + $0x1d0] sm:$0xff]   ;;  %v1326_v1 = vld [vmem:[#allocation2 + $0x1c8] sm:$0xff]  }
  0x21   :  { %1149 = vmatpush3.bf16.msra.mxu1 %v1288_v19  ;;  %1128 = vmatprep.subr.bf16.mxu0 %v1289_v20  ;;  %v1320_v59 = vld [vmem:[#allocation2 + $0x198] sm:$0xff]   ;;  %v1323_v62 = vld [vmem:[#allocation2 + $0x110] sm:$0xff]   ;;  %v1327_v2 = vld [vmem:[#allocation2 + $0x108] sm:$0xff]  }
  0x22   :  { %1150 = vmatprep.subr.bf16.mxu1 %v1290_v21  ;;  %v1324_v63 = vld [vmem:[#allocation2 + $0x190] sm:$0xff]   ;;  %v1328_v3 = vld [vmem:[#allocation2 + $0x188] sm:$0xff]   ;;  %v1329_v4 = vld [vmem:[#allocation2 + $0x140] sm:$0xff]  }
  0x23   :  { %v1330_v5 = vld [vmem:[#allocation2 + $0x1c0] sm:$0xff]   ;;  %v43_v8 = vld [vmem:[%s1532_s0 + $0x10] sm:$0xff]  ;;  %v44_v12 = vld [vmem:[%s1532_s0 + $0x18] sm:$0xff] }
  0x24   :  { %1129 = vmatpush3.bf16.msra.mxu0 %v1291_v22  ;;  %v1331_v6 = vld [vmem:[#allocation2 + $0x100] sm:$0xff]   ;;  %v47_v9 = vld [vmem:[%s1532_s0 + $0x30] sm:$0xff]  ;;  %v48_v13 = vld [vmem:[%s1532_s0 + $0x38] sm:$0xff] }
  0x25   :  { %1151 = vmatpush3.bf16.msra.mxu1 %v1292_v23  ;;  %1130 = vmatprep.subr.bf16.mxu0 %v1293_v24  ;;  %v1332_v7 = vld [vmem:[#allocation2 + $0x180] sm:$0xff]   ;;  %v1032_v10 = vcombine.low %v43_v8, %v47_v9  ;;  %v1033_v11 = vcombine.high %v43_v8, %v47_v9  ;;  %v1034_v14 = vcombine.low %v44_v12, %v48_v13  ;;  %v1333_v16 = vld [vmem:[%s1535_s3 + $0x38] sm:$0xff]   ;;  %v1334_v18 = vld [vmem:[%s1535_s3 + $0x30] sm:$0xff]  }
  0x26   :  { %1152 = vmatprep.subr.bf16.mxu1 %v1294_v25  ;;  %v1035_v15 = vcombine.high %v44_v12, %v48_v13  ;;  %v1335_v19 = vld [vmem:[%s1535_s3 + $0x28] sm:$0xff]   ;;  %v1336_v20 = vld [vmem:[%s1535_s3 + $0x20] sm:$0xff]   ;;  %v1337_v21 = vld [vmem:[%s1535_s3 + $0x18] sm:$0xff]  }
  0x27   :  { %v1338_v22 = vld [vmem:[%s1535_s3 + $0x10] sm:$0xff]   ;;  %v1339_v23 = vld [vmem:[%s1535_s3 + $0x8] sm:$0xff]   ;;  %v1340_v24 = vld [vmem:[%s1535_s3] sm:$0xff]  }
  0x28   :  { %1131 = vmatpush3.bf16.msra.mxu0 %v1295_v26  ;;  %v1341_v25 = vld [vmem:[%s1537_s5 + $0x38] sm:$0xff]   ;;  %v1342_v26 = vld [vmem:[%s1537_s5 + $0x30] sm:$0xff]   ;;  %v1027_v37 = vld [vmem:[%s1534_s2] ss:$0 sm:$0xff] }
  0x29   :  { %1153 = vmatpush3.bf16.msra.mxu1 %v1296_v27  ;;  %1132 = vmatprep.subr.bf16.mxu0 %v1297_v28  ;;  %v1343_v27 = vld [vmem:[%s1537_s5 + $0x28] sm:$0xff]   ;;  %v1344_v28 = vld [vmem:[%s1537_s5 + $0x20] sm:$0xff]  }
  0x2a   :  { %1154 = vmatprep.subr.bf16.mxu1 %v1298_v29  ;;  %v1345_v29 = vld [vmem:[%s1537_s5 + $0x18] sm:$0xff]  }
  0x2c   :  { %1133 = vmatpush3.bf16.msra.mxu0 %v1299_v30 }
  0x2d   :  { %1155 = vmatpush3.bf16.msra.mxu1 %v1300_v31  ;;  %1162 = vmatprep.subr.bf16.mxu0 %v1301_v40 }
  0x2e   :  { %1184 = vmatprep.subr.bf16.mxu1 %v1302_v41 }
  0x2f   :  { %641 = vmatmul.mubr.bf16.vlgmr.msra.gmra.mxu0 %v1028_v35 }
  0x30   :  { %682 = vmatmul.mubr.bf16.vlgmr.msra.gmra.mxu1 %v1030_v38  ;;  %1163 = vmatpush3.bf16.msra.mxu0 %v1303_v42 }
  0x31   :  { %1185 = vmatpush3.bf16.msra.mxu1 %v1304_v43  ;;  %1164 = vmatprep.subr.bf16.mxu0 %v1305_v44 }
  0x32   :  { %1186 = vmatprep.subr.bf16.mxu1 %v1306_v45  ;;  %722 = vmatprep.mubr.bf16.mxu0 %v1033_v11 }
  0x33   :  { %763 = vmatprep.mubr.bf16.mxu1 %v1035_v15  ;;  %v1109_v15 = vld [vmem:[%s1538_s6] ss:$0 sm:$0xff] }
  0x34   :  { %1165 = vmatpush3.bf16.msra.mxu0 %v1307_v46 }
  0x35   :  { %1187 = vmatpush3.bf16.msra.mxu1 %v1308_v47  ;;  %1166 = vmatprep.subr.bf16.mxu0 %v1309_v48 }
  0x36   :  { %1188 = vmatprep.subr.bf16.mxu1 %v1310_v49 }
  0x38   :  { %1167 = vmatpush3.bf16.msra.mxu0 %v1311_v50 }
  0x39   :  { %1189 = vmatpush3.bf16.msra.mxu1 %v1312_v51  ;;  %1168 = vmatprep.subr.bf16.mxu0 %v1313_v52 }
  0x3a   :  { %1190 = vmatprep.subr.bf16.mxu1 %v1314_v53 }
  0x3c   :  { %1169 = vmatpush3.bf16.msra.mxu0 %v1315_v54 }
  0x3d   :  { %1191 = vmatpush3.bf16.msra.mxu1 %v1316_v55  ;;  %1170 = vmatprep.subr.bf16.mxu0 %v1317_v56 }
  0x3e   :  { %1192 = vmatprep.subr.bf16.mxu1 %v1318_v57 }
  0x40   :  { %1171 = vmatpush3.bf16.msra.mxu0 %v1319_v58 }
  0x41   :  { %1193 = vmatpush3.bf16.msra.mxu1 %v1320_v59  ;;  %1172 = vmatprep.subr.bf16.mxu0 %v1321_v60 }
  0x42   :  { %1194 = vmatprep.subr.bf16.mxu1 %v1322_v61 }
  0x44   :  { %1173 = vmatpush3.bf16.msra.mxu0 %v1323_v62 }
  0x45   :  { %1195 = vmatpush3.bf16.msra.mxu1 %v1324_v63  ;;  %1174 = vmatprep.subr.bf16.mxu0 %v1325_v0 }
  0x46   :  { %1196 = vmatprep.subr.bf16.mxu1 %v1326_v1 }
  0x48   :  { %1175 = vmatpush3.bf16.msra.mxu0 %v1327_v2  ;;  %v1346_v2 = vld [vmem:[%s1537_s5 + $0x10] sm:$0xff]  }
  0x49   :  { %1197 = vmatpush3.bf16.msra.mxu1 %v1328_v3  ;;  %1176 = vmatprep.subr.bf16.mxu0 %v1329_v4  ;;  %v1347_v3 = vld [vmem:[%s1537_s5 + $0x8] sm:$0xff]   ;;  %v1348_v4 = vld [vmem:[%s1537_s5] sm:$0xff]  }
  0x4a   :  { %1198 = vmatprep.subr.bf16.mxu1 %v1330_v5  ;;  %v1100_v5 = vld [vmem:[%s1536_s4] ss:$0 sm:$0xff] }
  0x4c   :  { %1177 = vmatpush3.bf16.msra.mxu0 %v1331_v6 }
  0x4d   :  { %1199 = vmatpush3.bf16.msra.mxu1 %v1332_v7  ;;  %1224 = vmatprep.subr.bf16.mxu0 %v1382_v17 }
  0x4e   :  { %1244 = vmatprep.subr.bf16.mxu1 %v1382_v17 }
  0x4f   :  { %723 = vmatmul.mubr.bf16.vlgmr.msra.gmra.mxu0 %v1032_v10 }
  0x50   :  { %764 = vmatmul.mubr.bf16.vlgmr.msra.gmra.mxu1 %v1034_v14  ;;  %1225 = vmatpush3.bf16.msra.mxu0 %v1333_v16 }
  0x51   :  { %1226 = vmatprep.subr.bf16.mxu0 %v1382_v17  ;;  %1240 = vmatprep.mubr.msk.bf16.mxu0 %vm1383_vm0, %v1382_v17 }
  0x52   :  { %1260 = vmatprep.mubr.msk.bf16.mxu1 %vm1383_vm0, %v1382_v17  ;;  %1245 = vmatpush3.bf16.msra.mxu1 %v1341_v25 }
  0x53   :  { %1246 = vmatprep.subr.bf16.mxu1 %v1382_v17 }
  0x54   :  { %1227 = vmatpush3.bf16.msra.mxu0 %v1334_v18 }
  0x55   :  { %1228 = vmatprep.subr.bf16.mxu0 %v1382_v17 }
  0x56   :  { %1247 = vmatpush3.bf16.msra.mxu1 %v1342_v26 }
  0x57   :  { %1248 = vmatprep.subr.bf16.mxu1 %v1382_v17 }
  0x58   :  { %1229 = vmatpush3.bf16.msra.mxu0 %v1335_v19 }
  0x59   :  { %1230 = vmatprep.subr.bf16.mxu0 %v1382_v17 }
  0x5a   :  { %1249 = vmatpush3.bf16.msra.mxu1 %v1343_v27 }
  0x5b   :  { %1250 = vmatprep.subr.bf16.mxu1 %v1382_v17 }
  0x5c   :  { %1231 = vmatpush3.bf16.msra.mxu0 %v1336_v20 }
  0x5d   :  { %1232 = vmatprep.subr.bf16.mxu0 %v1382_v17 }
  0x5e   :  { %1251 = vmatpush3.bf16.msra.mxu1 %v1344_v28 }
  0x5f   :  { %1252 = vmatprep.subr.bf16.mxu1 %v1382_v17 }
  0x60   :  { %1233 = vmatpush3.bf16.msra.mxu0 %v1337_v21 }
  0x61   :  { %1234 = vmatprep.subr.bf16.mxu0 %v1382_v17 }
  0x62   :  { %1253 = vmatpush3.bf16.msra.mxu1 %v1345_v29 }
  0x63   :  { %1254 = vmatprep.subr.bf16.mxu1 %v1382_v17 }
  0x64   :  { %1235 = vmatpush3.bf16.msra.mxu0 %v1338_v22 }
  0x65   :  { %1236 = vmatprep.subr.bf16.mxu0 %v1382_v17 }
  0x66   :  { %1255 = vmatpush3.bf16.msra.mxu1 %v1346_v2 }
  0x67   :  { %1256 = vmatprep.subr.bf16.mxu1 %v1382_v17 }
  0x68   :  { %1237 = vmatpush3.bf16.msra.mxu0 %v1339_v23 }
  0x69   :  { %1238 = vmatprep.subr.bf16.mxu0 %v1382_v17 }
  0x6a   :  { %1257 = vmatpush3.bf16.msra.mxu1 %v1347_v3 }
  0x6b   :  { %1258 = vmatprep.subr.bf16.mxu1 %v1382_v17 }
  0x6c   :  { %1239 = vmatpush3.bf16.msra.mxu0 %v1340_v24 }
  0x6e   :  { %1259 = vmatpush3.bf16.msra.mxu1 %v1348_v4 }
  0xef   :  { %v1134_v30 = vpop.f32.mrf.mxu0 }
  0xf0   :  { %v1156_v31 = vpop.f32.mrf.mxu1 }
  0xf1   :  { %v1135_v32 = vpop.f32.mrf.mxu0 }
  0xf2   :  { %v1157_v33 = vpop.f32.mrf.mxu1  ;;  %v1136_v35 = vadd.f32 %v1135_v32, %v1134_v30 }
  0xf3   :  { %v1137_v34 = vpop.f32.mrf.mxu0  ;;  %v1158_v40 = vadd.f32 %v1157_v33, %v1156_v31 }
  0xf4   :  { %v1159_v36 = vpop.f32.mrf.mxu1  ;;  %v643_v39 = vadd.f32 %v1136_v35, %v1027_v37 }
  0xf5   :  { %v1138_v38 = vpop.f32.mrf.mxu0 }
  0xf6   :  { %v1139_v41 = vadd.f32 %v1138_v38, %v1137_v34  ;;  %v1160_v42 = vpop.f32.mrf.mxu1  ;;  %v684_v46 = vadd.f32 %v1158_v40, %v643_v39 }
  0xf7   :  { %v1161_v51 = vadd.f32 %v1160_v42, %v1159_v36 }
  0xf8   :  { %v646_v47 = vadd.f32 %v1139_v41, %v1027_v37 }
  0xfa   :  { %v687_v55 = vadd.f32 %v1161_v51, %v646_v47 }
 0x10f   :  { %v1178_v43 = vpop.f32.mrf.mxu0 }
 0x110   :  { %v1200_v44 = vpop.f32.mrf.mxu1 }
 0x111   :  { %v1179_v45 = vpop.f32.mrf.mxu0 }
 0x112   :  { %v1180_v48 = vadd.f32 %v1179_v45, %v1178_v43  ;;  %v1201_v49 = vpop.f32.mrf.mxu1 }
 0x113   :  { %v1181_v50 = vpop.f32.mrf.mxu0  ;;  %v1202_v56 = vadd.f32 %v1201_v49, %v1200_v44 }
 0x114   :  { %v725_v52 = vadd.f32 %v1180_v48, %v684_v46  ;;  %v1203_v53 = vpop.f32.mrf.mxu1 }
 0x115   :  { %v1182_v54 = vpop.f32.mrf.mxu0 }
 0x116   :  { %v1183_v57 = vadd.f32 %v1182_v54, %v1181_v50  ;;  %v1204_v58 = vpop.f32.mrf.mxu1  ;;  %v766_v59 = vadd.f32 %v1202_v56, %v725_v52 }
 0x117   :  { %v1205_v61 = vadd.f32 %v1204_v58, %v1203_v53 }
 0x118   :  { %v728_v60 = vadd.f32 %v1183_v57, %v687_v55  ;;  %v772_v63 = vmax.f32 %v766_v59, 0.0 }
 0x11a   :  { %v769_v62 = vadd.f32 %v1205_v61, %v728_v60 }
 0x11c   :  { %v773_v0 = vmax.f32 %v769_v62, 0.0 }
 0x11e   :  { %v774_v1 = vpack.c.bf16 %v773_v0, %v772_v63 }
 0x120   :  { %1241 = vmatmul.mubr.bf16.vlgmr.msra.gmra.mxu0 %v774_v1 }
 0x1e0   :  { %v880_v6 = vpop.f32.mrf.mxu0 }
 0x1e1   :  { %v881_v8 = vadd.f32 %v1100_v5, %v880_v6 }
 0x1e2   :  { %v1242_v7 = vpop.f32.mrf.mxu0 }
 0x1e3   :  { %v887_v12 = vmax.f32 %v881_v8, 0.0 }
 0x1e4   :  { %v883_v9 = vpop.f32.mrf.mxu0 }
 0x1e5   :  { %v884_v10 = vadd.f32 %v1100_v5, %v883_v9 }
 0x1e6   :  { %v1243_v11 = vpop.f32.mrf.mxu0 }
 0x1e7   :  { %v888_v13 = vmax.f32 %v884_v10, 0.0 }
 0x1e9   :  { %v889_v14 = vpack.c.bf16 %v888_v13, %v887_v12 }
 0x1eb   :  { %1261 = vmatmul.mubr.bf16.vlgmr.msra.gmra.mxu1 %v889_v14 }
 0x2ab   :  { %v995_v16 = vpop.f32.mrf.mxu1 }
 0x2ac   :  { %v996_v17 = vadd.f32 %v1109_v15, %v995_v16 }
 0x2ad   :  { %v1262_v18 = vpop.f32.mrf.mxu1 }
 0x2ae   :  { %1002 = vmax.xlane.f32.xlu0 %v996_v17 }
 0x2af   :  { %v998_v19 = vpop.f32.mrf.mxu1 }
 0x2b0   :  { %v999_v20 = vadd.f32 %v1109_v15, %v998_v19 }
 0x2b1   :  { %v1263_v21 = vpop.f32.mrf.mxu1 }
 0x2b2   :  { %1004 = vmax.xlane.f32.xlu0 %v999_v20 }
 0x337   :  { %v1003_v22 = vpop.xlane.xlu0 %1002 }
 0x338   :  { %v1006_v23 = vsub.f32 %v996_v17, %v1003_v22 }
 0x33a   :  { %v1008_v24 = vmul.f32 1.442695, %v1006_v23 }
 0x33b   :  { %v1005_v25 = vpop.xlane.xlu0 %1004 }
 0x33c   :  { %1349 = vpow2.f32 %v1008_v24  ;;  %v1007_v26 = vsub.f32 %v999_v20, %v1005_v25 }
 0x33e   :  { %v1010_v27 = vmul.f32 1.442695, %v1007_v26 }
 0x340   :  { %1351 = vpow2.f32 %v1010_v27 }
 0x349   :  { %v1350_v28 = vpop.eup %1349 }
 0x34a   :  { %1012 = vadd.xlane.f32.xlu1 %v1350_v28 }
 0x34d   :  { %v1352_v29 = vpop.eup %1351 }
 0x34e   :  { %1014 = vadd.xlane.f32.xlu1 %v1352_v29 }
 0x3d3   :  { %v1013_v30 = vpop.xlane.xlu1 %1012 }
 0x3d4   :  { %1353 = vrcp.f32 %v1013_v30 }
 0x3d7   :  { %v1015_v31 = vpop.xlane.xlu1 %1014 }
 0x3d8   :  { %1355 = vrcp.f32 %v1015_v31 }
 0x3e1   :  { %v1354_v32 = vpop.eup %1353 }
 0x3e2   :  { %v1018_v33 = vmul.f32 %v1354_v32, %v1350_v28 }
 0x3e4   :  { %1020 = vst [vmem:[%s1539_s7] sm:$0xff] %v1018_v33 }
 0x3e5   :  { %v1356_v34 = vpop.eup %1355 }
 0x3e6   :  { %v1019_v35 = vmul.f32 %v1356_v34, %v1352_v29 }
 0x3e8   :  { %1021 = vst [vmem:[%s1539_s7 + $0x8] sm:$0xff] %v1019_v35 }
 0x3e9   :  { %1026 = vsyncpa [#allocation3], 1 }

</bundles_post_ra>
